<compile_context>
chip_gen: v7x
topology: tpu7x:2x2x1
jax: 0.10.0
libtpu: 0.0.40
codegen_flags: <defaults>
</compile_context>

<pallas_src>
import functools

import jax
import jax.numpy as jnp
from jax.experimental import pallas as pl
from jax.experimental.pallas import tpu as pltpu


# ----------------------------- tiling / budgeting helpers -----------------------------

def _pick_tile(n, prefs, min_blocks=1):
    """Largest preferred tile dividing n (preferring >= min_blocks grid steps)."""
    for t in prefs:
        if n % t == 0 and n // t >= min_blocks:
            return t
    for t in prefs:
        if n % t == 0:
            return t
    return n


def _pick_source_tile(n):
    """Source-axis tile: prefer a single pass over the whole source axis."""
    if n <= 2048:
        return n
    for t in (2048, 1024, 512, 256, 128):
        if n % t == 0:
            return t
    return n


def _tile_vmem_bytes(shape, dtype):
    """Approximate VMEM footprint of one block, including (sublane, lane) padding."""
    itemsize = jnp.dtype(dtype).itemsize
    sub = {1: 32, 2: 16, 4: 8}.get(itemsize, 8)
    if len(shape) == 1:
        lead, r, c = 1, 1, shape[0]
    else:
        lead = 1
        for s in shape[:-2]:
            lead *= int(s)
        r, c = shape[-2], shape[-1]
    r = -(-r // sub) * sub
    c = -(-c // 128) * 128
    return lead * r * c * itemsize


def _vmem_limit(est_bytes):
    """Only override the scoped-VMEM default when the tiles actually need it."""
    need = int(2 * est_bytes) + (2 << 20)
    if need <= 16 * 1024 * 1024:        # below every generation's default scoped limit
        return None
    return min(need, 48 * 1024 * 1024)  # stay well under v7x's 64 MiB physical VMEM


# ----------------------------- projection kernel -----------------------------

def project_kernel(x_ref, w_ref, a_ref, xw_ref, alpha_ref):
    """xw = x @ W (stored bf16); alpha = xw_f32 @ A_blockdiag (all heads, f32 logits)."""
    xw = jnp.dot(x_ref[...], w_ref[...], preferred_element_type=jnp.float32)
    alpha_ref[...] = jnp.dot(xw, a_ref[...], preferred_element_type=jnp.float32)
    xw_ref[...] = xw.astype(xw_ref.dtype)


def gat_project(x, w, a_mat):
    n, f = x.shape
    hc = w.shape[1]
    two_h = a_mat.shape[1]
    tm = _pick_tile(n, (512, 256, 128, 64, 32, 16, 8), min_blocks=2)
    return pl.pallas_call(
        project_kernel,
        out_shape=(jax.ShapeDtypeStruct((n, hc), jnp.bfloat16),    # xw streamed as bf16
                   jax.ShapeDtypeStruct((n, two_h), jnp.float32)),  # logits stay f32
        grid_spec=pltpu.PrefetchScalarGridSpec(
            num_scalar_prefetch=0,
            grid=(n // tm,),
            in_specs=[pl.BlockSpec((tm, f), lambda i: (i, 0)),
                      pl.BlockSpec((f, hc), lambda i: (0, 0)),
                      pl.BlockSpec((hc, two_h), lambda i: (0, 0))],
            out_specs=[pl.BlockSpec((tm, hc), lambda i: (i, 0)),
                       pl.BlockSpec((tm, two_h), lambda i: (i, 0))]),
        compiler_params=pltpu.CompilerParams(dimension_semantics=("parallel",)),
    )(x, w, a_mat)


# ----------------------------- attention kernels: single source pass -----------------------------

def gat_hidden_single_kernel(*refs, heads, out_ch, neg_slope, has_residual):
    """One target-row tile vs the FULL source axis: plain masked softmax (no flash
    correction), GATConv-bias+BN folded affine [+ residual], ELU, full-width store."""
    if has_residual:
        (adj_ref, a_dst_ref, a_srcT_ref, xw_ref, scale_ref, shift_ref, res_ref,
         out_ref, acc_scr) = refs
    else:
        (adj_ref, a_dst_ref, a_srcT_ref, xw_ref, scale_ref, shift_ref,
         out_ref, acc_scr) = refs
        res_ref = None

    mask = adj_ref[...] != 0
    neg_bias = jnp.where(mask, jnp.float32(0.0), jnp.float32(-1e30))  # shared by heads
    a_dst = a_dst_ref[...]                      # [tq, H]  f32
    a_src = a_srcT_ref[...]                     # [H, N]   f32
    xw = xw_ref[...]                            # [N, H*C] bf16 source values
    neg = jnp.float32(neg_slope)

    for h in range(heads):
        lo = h * out_ch
        e = a_dst[:, h:h + 1] + a_src[h:h + 1, :]        # broadcast add (VPU)
        e = jnp.maximum(e, neg * e) + neg_bias           # LeakyReLU + additive mask
        m = jnp.max(e, axis=-1, keepdims=True)
        p = jnp.where(mask, jnp.exp(e - m), jnp.float32(0.0))
        inv = pl.reciprocal(jnp.maximum(jnp.sum(p, axis=-1, keepdims=True),
                                        jnp.float32(1e-16)), approx=True)
        agg = jnp.dot(p.astype(jnp.bfloat16), xw[:, lo:lo + out_ch],
                      preferred_element_type=jnp.float32)
        acc_scr[:, lo:lo + out_ch] = agg * inv

    y = acc_scr[...] * scale_ref[...] + shift_ref[...]   # GATConv bias + BN folded
    if has_residual:
        y = y + res_ref[...]
    out_ref[...] = jnp.where(y > 0.0, y,
                             jnp.exp(jnp.minimum(y, 0.0)) - 1.0).astype(out_ref.dtype)


def gat_out_single_kernel(adj_ref, a_dst_ref, a_srcT_ref, xw_ref, bias_ref, out_ref,
                          *, heads, out_ch, neg_slope):
    """Output GATConv (concat=False: mean over heads) + bias, single source pass."""
    mask = adj_ref[...] != 0
    neg_bias = jnp.where(mask, jnp.float32(0.0), jnp.float32(-1e30))
    a_dst = a_dst_ref[...]
    a_src = a_srcT_ref[...]
    xw = xw_ref[...]
    neg = jnp.float32(neg_slope)

    y = None
    for h in range(heads):
        lo = h * out_ch
        e = a_dst[:, h:h + 1] + a_src[h:h + 1, :]
        e = jnp.maximum(e, neg * e) + neg_bias
        m = jnp.max(e, axis=-1, keepdims=True)
        p = jnp.where(mask, jnp.exp(e - m), jnp.float32(0.0))
        inv = pl.reciprocal(jnp.maximum(jnp.sum(p, axis=-1, keepdims=True),
                                        jnp.float32(1e-16)), approx=True)
        agg = jnp.dot(p.astype(jnp.bfloat16), xw[:, lo:lo + out_ch],
                      preferred_element_type=jnp.float32) * inv
        y = agg if y is None else y + agg
    if heads > 1:
        y = y * jnp.float32(1.0 / heads)
    out_ref[...] = (y + bias_ref[...]).astype(out_ref.dtype)


# ----------------------------- attention kernels: flash (multi source tiles) -----------------------------

def _flash_accumulate(adj_ref, a_dst_ref, a_srcT_ref, xw_ref, m_scr, l_scr, acc_scr,
                      *, heads, out_ch, neg_slope):
    """Online-softmax accumulation of one (target-tile, source-tile) block."""
    @pl.when(pl.program_id(1) == 0)
    def _():
        m_scr[...] = jnp.full_like(m_scr, -jnp.inf)
        l_scr[...] = jnp.zeros_like(l_scr)
        acc_scr[...] = jnp.zeros_like(acc_scr)

    mask = adj_ref[...] != 0
    neg_bias = jnp.where(mask, jnp.float32(0.0), jnp.float32(-1e30))
    a_dst = a_dst_ref[...]                      # [tq, H]
    a_src = a_srcT_ref[...]                     # [H, tk]
    xw = xw_ref[...]                            # [tk, H*C] bf16
    neg = jnp.float32(neg_slope)

    for h in range(heads):
        lo = h * out_ch
        e = a_dst[:, h:h + 1] + a_src[h:h + 1, :]
        e = jnp.maximum(e, neg * e) + neg_bias
        m_old = m_scr[h]                                    # (tq, 1) per-head slab
        m_new = jnp.maximum(m_old, jnp.max(e, axis=-1, keepdims=True))
        corr = jnp.exp(m_old - m_new)
        p = jnp.where(mask, jnp.exp(e - m_new), jnp.float32(0.0))
        l_scr[h] = corr * l_scr[h] + jnp.sum(p, axis=-1, keepdims=True)
        m_scr[h] = m_new
        acc_scr[:, lo:lo + out_ch] = (
            corr * acc_scr[:, lo:lo + out_ch]
            + jnp.dot(p.astype(jnp.bfloat16), xw[:, lo:lo + out_ch],
                      preferred_element_type=jnp.float32))


def gat_hidden_flash_kernel(*refs, heads, out_ch, neg_slope, has_residual):
    if has_residual:
        (adj_ref, a_dst_ref, a_srcT_ref, xw_ref, scale_ref, shift_ref, res_ref,
         out_ref, m_scr, l_scr, acc_scr) = refs
    else:
        (adj_ref, a_dst_ref, a_srcT_ref, xw_ref, scale_ref, shift_ref,
         out_ref, m_scr, l_scr, acc_scr) = refs
        res_ref = None

    _flash_accumulate(adj_ref, a_dst_ref, a_srcT_ref, xw_ref, m_scr, l_scr, acc_scr,
                      heads=heads, out_ch=out_ch, neg_slope=neg_slope)

    @pl.when(pl.program_id(1) == pl.num_programs(1) - 1)
    def _():
        for h in range(heads):
            lo = h * out_ch
            inv = pl.reciprocal(jnp.maximum(l_scr[h], jnp.float32(1e-16)), approx=True)
            acc_scr[:, lo:lo + out_ch] = acc_scr[:, lo:lo + out_ch] * inv
        y = acc_scr[...] * scale_ref[...] + shift_ref[...]
        if has_residual:
            y = y + res_ref[...]
        out_ref[...] = jnp.where(y > 0.0, y,
                                 jnp.exp(jnp.minimum(y, 0.0)) - 1.0).astype(out_ref.dtype)


def gat_out_flash_kernel(adj_ref, a_dst_ref, a_srcT_ref, xw_ref, bias_ref, out_ref,
                         m_scr, l_scr, acc_scr, *, heads, out_ch, neg_slope):
    _flash_accumulate(adj_ref, a_dst_ref, a_srcT_ref, xw_ref, m_scr, l_scr, acc_scr,
                      heads=heads, out_ch=out_ch, neg_slope=neg_slope)

    @pl.when(pl.program_id(1) == pl.num_programs(1) - 1)
    def _():
        y = None
        for h in range(heads):
            lo = h * out_ch
            inv = pl.reciprocal(jnp.maximum(l_scr[h], jnp.float32(1e-16)), approx=True)
            part = acc_scr[:, lo:lo + out_ch] * inv
            y = part if y is None else y + part
        if heads > 1:
            y = y * jnp.float32(1.0 / heads)
        out_ref[...] = (y + bias_ref[...]).astype(out_ref.dtype)


# ----------------------------- attention dispatcher -----------------------------

def gat_attention(adj_i8, a_dst, a_srcT, xw, extras, *, heads, out_ch, neg_slope,
                  mode, residual=None):
    n = adj_i8.shape[0]
    hc = heads * out_ch
    out_cols = hc if mode == "hidden" else out_ch
    # Keep >= 2 target blocks so the "parallel" axis keeps both v7x cores busy.
    tq = _pick_tile(n, (512, 256, 128, 64, 32, 16, 8), min_blocks=2)
    tk = _pick_source_tile(n)
    single = tk >= n
    has_res = residual is not None

    # Double-buffered-input + output + scratch VMEM budget -> scoped-VMEM limit.
    est = (2 * _tile_vmem_bytes((tq, tk), jnp.int8)
           + 2 * _tile_vmem_bytes((tq, heads), jnp.float32)
           + 2 * _tile_vmem_bytes((heads, tk), jnp.float32)
           + 2 * _tile_vmem_bytes((tk, hc), jnp.bfloat16)
           + 2 * _tile_vmem_bytes((tq, out_cols), jnp.float32)
           + 4 * _tile_vmem_bytes((1, hc), jnp.float32)
           + _tile_vmem_bytes((tq, hc), jnp.float32))
    if has_res:
        est += 2 * _tile_vmem_bytes((tq, hc), jnp.float32)
    if not single:
        est += 2 * _tile_vmem_bytes((heads, tq, 1), jnp.float32)

    if single:
        grid = (n // tq,)
        dims = ("parallel",)
        in_specs = [pl.BlockSpec((tq, n), lambda i: (i, 0)),       # adj tile (int8)
                    pl.BlockSpec((tq, heads), lambda i: (i, 0)),   # target dst-scores
                    pl.BlockSpec((heads, n), lambda i: (0, 0)),    # source src-scores (rows)
                    pl.BlockSpec((n, hc), lambda i: (0, 0))]       # source values (bf16)
        out_specs = pl.BlockSpec((tq, out_cols), lambda i: (i, 0))
        spec_bcast = lambda i: (0, 0)
        spec_rows = lambda i: (i, 0)
    else:
        grid = (n // tq, n // tk)
        dims = ("parallel", "arbitrary")
        in_specs = [pl.BlockSpec((tq, tk), lambda i, k: (i, k)),
                    pl.BlockSpec((tq, heads), lambda i, k: (i, 0)),
                    pl.BlockSpec((heads, tk), lambda i, k: (0, k)),
                    pl.BlockSpec((tk, hc), lambda i, k: (k, 0))]
        out_specs = pl.BlockSpec((tq, out_cols), lambda i, k: (i, 0))
        spec_bcast = lambda i, k: (0, 0)
        spec_rows = lambda i, k: (i, 0)

    args = [adj_i8, a_dst, a_srcT, xw]

    if mode == "hidden":
        scale, shift = extras
        in_specs += [pl.BlockSpec((1, hc), spec_bcast),
                     pl.BlockSpec((1, hc), spec_bcast)]
        args += [scale, shift]
        if has_res:
            in_specs.append(pl.BlockSpec((tq, hc), spec_rows))
            args.append(residual)
        if single:
            kern = functools.partial(gat_hidden_single_kernel, heads=heads,
                                     out_ch=out_ch, neg_slope=neg_slope,
                                     has_residual=has_res)
            scratch = [pltpu.VMEM((tq, hc), jnp.float32)]
        else:
            kern = functools.partial(gat_hidden_flash_kernel, heads=heads,
                                     out_ch=out_ch, neg_slope=neg_slope,
                                     has_residual=has_res)
            scratch = [pltpu.VMEM((heads, tq, 1), jnp.float32),   # running max / head
                       pltpu.VMEM((heads, tq, 1), jnp.float32),   # running denom / head
                       pltpu.VMEM((tq, hc), jnp.float32)]         # accumulator
    else:
        (bias,) = extras
        in_specs.append(pl.BlockSpec((1, out_ch), spec_bcast))
        args.append(bias)
        if single:
            kern = functools.partial(gat_out_single_kernel, heads=heads,
                                     out_ch=out_ch, neg_slope=neg_slope)
            scratch = []
        else:
            kern = functools.partial(gat_out_flash_kernel, heads=heads,
                                     out_ch=out_ch, neg_slope=neg_slope)
            scratch = [pltpu.VMEM((heads, tq, 1), jnp.float32),
                       pltpu.VMEM((heads, tq, 1), jnp.float32),
                       pltpu.VMEM((tq, hc), jnp.float32)]

    return pl.pallas_call(
        kern,
        out_shape=jax.ShapeDtypeStruct((n, out_cols), jnp.float32),
        grid_spec=pltpu.PrefetchScalarGridSpec(
            num_scalar_prefetch=0,
            grid=grid,
            in_specs=in_specs,
            out_specs=out_specs,
            scratch_shapes=scratch),
        compiler_params=pltpu.CompilerParams(
            dimension_semantics=dims, vmem_limit_bytes=_vmem_limit(est)),
    )(*args)


# ----------------------------- layer / forward wrappers -----------------------------

def gat_layer(x, adj_i8, lp, *, heads, out_ch, neg_slope, residual, mode):
    H = heads
    xw, alpha = gat_project(x, lp["W"], lp["A"])
    # TODO(synk): alpha ([N, 2H]) still round-trips HBM and is split/transposed in XLA;
    # the traffic is N*2H*4 bytes/layer (negligible vs the N^2 adj stream).
    a_srcT = alpha[:, :H].T                   # [H, N] source scores (row layout)
    a_dst = alpha[:, H:]                      # [N, H] target scores
    extras = (lp["scale"], lp["shift"]) if mode == "hidden" else (lp["bias"],)
    return gat_attention(adj_i8, a_dst, a_srcT, xw, extras, heads=H, out_ch=out_ch,
                         neg_slope=neg_slope, mode=mode, residual=residual)


def gat_value_forward(x, adj_i8, params, *, nheads, nhid, nclass, neg_slope):
    # TODO(synk): training-mode dropout (features & attention) not implemented;
    # forward is eval-mode, where F.dropout is identity and BN uses running stats.
    h = x
    for l, lp in enumerate(params["layers"]):
        res = h if l > 0 else None            # layer 0: no residual (no zeros DMA)
        h = gat_layer(h, adj_i8, lp, heads=nheads, out_ch=nhid,
                      neg_slope=neg_slope, residual=res, mode="hidden")
    op = params["out"]
    c_pad = op["W"].shape[1]
    y = gat_layer(h, adj_i8, op, heads=1, out_ch=c_pad,
                  neg_slope=neg_slope, residual=None, mode="out")
    return y[:, :nclass]                      # drop output-layer lane padding


# ----------------------------- param init (deterministic, hoisted prep) -----------------------------

def _glorot(key, shape):
    fan_in, fan_out = shape[0], shape[1]
    limit = (6.0 / (fan_in + fan_out)) ** 0.5
    return jax.random.uniform(key, shape, jnp.float32, -limit, limit)


def _attn_blockdiag(att_src, att_dst):
    """[C, H] src/dst vectors -> block-diag [H*C, 2H]: xw @ A = [src | dst] logits."""
    c, h = att_src.shape
    a = jnp.zeros((h * c, 2 * h), jnp.float32)
    for i in range(h):
        a = a.at[i * c:(i + 1) * c, i].set(att_src[:, i])
        a = a.at[i * c:(i + 1) * c, h + i].set(att_dst[:, i])
    return a


def init_params(key, nfeat, nhid, nclass, nlayers, nheads, bn_eps=1e-5):
    """Deterministic params; block-diag attention matrices, GATConv-bias+BN folding and
    output-layer lane padding are precomputed here (hoisted off the forward path)."""
    params = {"layers": []}
    for l in range(nlayers):
        fin = nfeat if l == 0 else nhid * nheads
        key, k1, k2, k3 = jax.random.split(key, 4)
        att_src = _glorot(k2, (nhid, nheads))           # stored as [C, H]
        att_dst = _glorot(k3, (nhid, nheads))
        bias = jnp.zeros((1, nheads * nhid), jnp.float32)
        # BatchNorm1d eval affine (fresh init: gamma=1, beta=0, mean=0, var=1)
        gamma = jnp.ones((1, nheads * nhid), jnp.float32)
        beta = jnp.zeros((1, nheads * nhid), jnp.float32)
        mean = jnp.zeros((1, nheads * nhid), jnp.float32)
        var = jnp.ones((1, nheads * nhid), jnp.float32)
        scale = gamma / jnp.sqrt(var + bn_eps)
        shift = beta - mean * scale + bias * scale      # GATConv bias folded into BN
        params["layers"].append(dict(
            W=_glorot(k1, (fin, nheads * nhid)),
            A=_attn_blockdiag(att_src, att_dst),
            scale=scale, shift=shift))

    # Output GATConv (heads=1, concat=False). Lane-pad nclass -> multiple of 128 so
    # every out-layer ref is full-width; zero padding keeps the math exact.
    key, k1, k2, k3 = jax.random.split(key, 4)
    c_pad = ((nclass + 127) // 128) * 128
    w = _glorot(k1, (nhid * nheads, nclass))
    att_src = _glorot(k2, (nclass, 1))
    att_dst = _glorot(k3, (nclass, 1))
    params["out"] = dict(
        W=jnp.zeros((nhid * nheads, c_pad), jnp.float32).at[:, :nclass].set(w),
        A=_attn_blockdiag(
            jnp.zeros((c_pad, 1), jnp.float32).at[:nclass].set(att_src),
            jnp.zeros((c_pad, 1), jnp.float32).at[:nclass].set(att_dst)),
        bias=jnp.zeros((1, c_pad), jnp.float32))
    return params


# ----------------------------- main -----------------------------

if __name__ == "__main__":
    N, nfeat, nhid, nheads, nclass, nlayers = 256, 32, 16, 2, 1, 2
    alpha = 0.2           # LeakyReLU negative slope
    key = jax.random.PRNGKey(0)
    k_x, k_a, k_p = jax.random.split(key, 3)

    x = jax.random.normal(k_x, (N, nfeat), jnp.float32)
    # TODO(synk): for very large N on v5e, pack adj to a 1-bit mask to cut HBM traffic.
    adj = jnp.logical_or(jax.random.uniform(k_a, (N, N)) > 0.5,
                         jnp.eye(N, dtype=bool)).astype(jnp.int8)   # self-loops included

    params = init_params(k_p, nfeat, nhid, nclass, nlayers, nheads)

    out = gat_value_forward(x, adj, params, nheads=nheads, nhid=nhid,
                            nclass=nclass, neg_slope=alpha)
    out = jax.block_until_ready(out)
    assert out.shape == (N, nclass) and out.dtype == jnp.float32
    assert bool(jnp.all(jnp.isfinite(out)))
    print("KERNEL_OK")
</pallas_src>

<mosaic_0001>
module attributes {stable_mosaic.version = 11 : i64} {
  func.func @project_kernel(%arg0: i32, %arg1: memref<128x32xf32, #tpu.memory_space<vmem>>, %arg2: memref<32x32xf32, #tpu.memory_space<vmem>>, %arg3: memref<32x4xf32, #tpu.memory_space<vmem>>, %arg4: memref<128x32xbf16, #tpu.memory_space<vmem>>, %arg5: memref<128x4xf32, #tpu.memory_space<vmem>>) attributes {dimension_semantics = [#tpu.dimension_semantics<parallel>], iteration_bounds = array<i64: 2>, scalar_prefetch = 0 : i64, scratch_operands = 0 : i64, tpu.core_type = #tpu.core_type<tc>, window_params = [{transform_indices = @transform_0, window_bounds = array<i64: 128, 32>}, {pipeline_mode = #tpu.pipeline_mode<synchronous>, transform_indices = @transform_1, window_bounds = array<i64: 32, 32>}, {pipeline_mode = #tpu.pipeline_mode<synchronous>, transform_indices = @transform_2, window_bounds = array<i64: 32, 4>}, {transform_indices = @transform_3, window_bounds = array<i64: 128, 32>}, {transform_indices = @transform_4, window_bounds = array<i64: 128, 4>}]} {
    %c0 = arith.constant 0 : index
    %c0_0 = arith.constant 0 : index
    %0 = vector.load %arg1[%c0, %c0_0] : memref<128x32xf32, #tpu.memory_space<vmem>>, vector<128x32xf32>
    %c0_1 = arith.constant 0 : index
    %c0_2 = arith.constant 0 : index
    %1 = vector.load %arg2[%c0_1, %c0_2] : memref<32x32xf32, #tpu.memory_space<vmem>>, vector<32x32xf32>
    %cst = arith.constant dense<0.000000e+00> : vector<128x32xf32>
    %2 = tpu.matmul %0, %1, %cst {dimension_numbers = #tpu.dot_dimension_numbers<[1], [0], [0], [1], [0, 0, 1, 1], [], []>} : vector<128x32xf32>, vector<32x32xf32>, vector<128x32xf32> -> vector<128x32xf32>
    %c0_3 = arith.constant 0 : index
    %c0_4 = arith.constant 0 : index
    %3 = vector.load %arg3[%c0_3, %c0_4] : memref<32x4xf32, #tpu.memory_space<vmem>>, vector<32x4xf32>
    %cst_5 = arith.constant dense<0.000000e+00> : vector<128x4xf32>
    %4 = tpu.matmul %2, %3, %cst_5 {dimension_numbers = #tpu.dot_dimension_numbers<[1], [0], [0], [1], [0, 0, 1, 1], [], []>} : vector<128x32xf32>, vector<32x4xf32>, vector<128x4xf32> -> vector<128x4xf32>
    %c0_6 = arith.constant 0 : index
    %c0_7 = arith.constant 0 : index
    %5 = vector.load %arg5[%c0_6, %c0_7] : memref<128x4xf32, #tpu.memory_space<vmem>>, vector<128x4xf32>
    tpu.vector_store %arg5[%c0_6, %c0_7], %4 {strides = array<i32>} : memref<128x4xf32, #tpu.memory_space<vmem>>, vector<128x4xf32>,
    %6 = arith.truncf %2 : vector<128x32xf32> to vector<128x32xbf16>
    %c0_8 = arith.constant 0 : index
    %c0_9 = arith.constant 0 : index
    %7 = vector.load %arg4[%c0_8, %c0_9] : memref<128x32xbf16, #tpu.memory_space<vmem>>, vector<128x32xbf16>
    tpu.vector_store %arg4[%c0_8, %c0_9], %6 {strides = array<i32>} : memref<128x32xbf16, #tpu.memory_space<vmem>>, vector<128x32xbf16>,
    return
  }
  func.func @transform_0(%arg0: i32) -> (i32, i32) {
    %c0_i32 = arith.constant 0 : i32
    %c0_i32_0 = arith.constant 0 : i32
    return %arg0, %c0_i32 : i32, i32
  }
  func.func @transform_1(%arg0: i32) -> (i32, i32) {
    %c0_i32 = arith.constant 0 : i32
    %c0_i32_0 = arith.constant 0 : i32
    %c0_i32_1 = arith.constant 0 : i32
    return %c0_i32, %c0_i32_0 : i32, i32
  }
  func.func @transform_2(%arg0: i32) -> (i32, i32) {
    %c0_i32 = arith.constant 0 : i32
    %c0_i32_0 = arith.constant 0 : i32
    %c0_i32_1 = arith.constant 0 : i32
    return %c0_i32, %c0_i32_0 : i32, i32
  }
  func.func @transform_3(%arg0: i32) -> (i32, i32) {
    %c0_i32 = arith.constant 0 : i32
    %c0_i32_0 = arith.constant 0 : i32
    return %arg0, %c0_i32 : i32, i32
  }
  func.func @transform_4(%arg0: i32) -> (i32, i32) {
    %c0_i32 = arith.constant 0 : i32
    %c0_i32_0 = arith.constant 0 : i32
    return %arg0, %c0_i32 : i32, i32
  }
}

</mosaic_0001>

<bundles_post_ra>
// kernel: tpu_custom_call.1
= control target key start
LH: loop header
LB: loop body
LE: loop exit
PB: predicated region body
PF: predicated region fallthrough
CT: control target
= control target key end

     0   :  { %s1052_s15 = smov 0   ;;  %s1222_s0 = inlined_call_operand.vmem [shape: f32[256,32], index: 0, kind: input, shape index: {}]   ;;  %s1223_s1 = inlined_call_operand.vmem [shape: f32[32,32], index: 1, kind: input, shape index: {}]   ;;  %s1224_s2 = inlined_call_operand.vmem [shape: f32[32,4], index: 2, kind: input, shape index: {}]   ;;  %s1225_s3 = inlined_call_operand.vmem [shape: bf16[256,32], index: 3, kind: output, shape index: {0}]   ;;  %s1226_s4 = inlined_call_operand.vmem [shape: f32[256,4], index: 4, kind: output, shape index: {1}]  }
   0x1 LB: > { %s814_s16 = sadd.s32 4294967295, %s1025_s15   ;;  %p818_p0 = scmp.ge.s32.totalorder %s1025_s15, 1  ;;  %s1025_s15 = sphi %s1052_s15, %s15_s15  }
   0x2   : > { %p166_p1 = scmp.lt.s32.totalorder %s1025_s15, 3 }
   0x4   : > { %p167_p2 = pnand %p818_p0, %p166_p1 }
   0x5   : > { %v231_v0 = vld [vmem:[%s1223_s1] sm:$0xff] (!%p167_p2)  ;;  %v232_v1 = vld [vmem:[%s1223_s1 + $0x8] sm:$0xff] (!%p167_p2)  ;;  %v233_v2 = vld [vmem:[%s1223_s1 + $0x10] sm:$0xff] (!%p167_p2)  ;;  %s819_s23 = sshll.u32 (!%p167_p2), %s814_s16, 4  ;;  %vm235_vm0 = vcmask (!%p167_p2), 261120   ;;  %vm707_vm1 = vcmask (!%p167_p2), 257024  }
   0x6   : > { %170 = sbr.rel (%p167_p2) target bundleno = 474 (0x1da), region = 32  ;;  %v995_v3 = vpack.c.bf16 (!%p167_p2), %v232_v1, %v231_v0  ;;  %v234_v4 = vld [vmem:[%s1223_s1 + $0x18] sm:$0xff] (!%p167_p2)  ;;  %p198_p3 = scmp.lt.s32.totalorder (!%p167_p2), %s819_s23, 31  ;;  %v429_v5 = vld [vmem:[%s1224_s2] sm:$0xff] (!%p167_p2)  ;;  %v430_v6 = vld [vmem:[%s1224_s2 + $0x8] sm:$0xff] (!%p167_p2)  ;;  %vm626_vm2 = vcmask (!%p167_p2), 31744  }
   0x7   : > { %v999_v7 = vpack.c.bf16 (!%p167_p2), %v234_v4, %v233_v2  ;;  %v1003_v8 = vpack.c.bf16 (!%p167_p2), %v430_v6, %v429_v5  ;;  %v431_v9 = vld [vmem:[%s1224_s2 + $0x10] sm:$0xff] (!%p167_p2)  ;;  %v432_v10 = vld [vmem:[%s1224_s2 + $0x18] sm:$0xff] (!%p167_p2) }
   0x8   : > { %996 = vmatprep.subr.bf16.mxu0 (!%p167_p2), %v995_v3  ;;  %v1007_v11 = vpack.c.bf16 (!%p167_p2), %v432_v10, %v431_v9 }
   0x9   : > { %998 = vmatpush3.bf16.msra.mxu0 (!%p167_p2), %v995_v3  ;;  %1004 = vmatprep.subr.bf16.mxu1 (!%p167_p2), %v1003_v8 }
   0xa   : > { %1000 = vmatprep.subr.bf16.mxu0 (!%p167_p2), %v999_v7  ;;  %1006 = vmatpush3.bf16.msra.mxu1 (!%p167_p2), %v1003_v8 }
   0xb   : > { %1008 = vmatprep.subr.bf16.mxu1 (!%p167_p2), %v1007_v11 }
   0xd   : > { %s1228_s23 = smov (!%p198_p3, %s819_s23), 31  ;;  %1002 = vmatpush3.bf16.msra.mxu0 %v999_v7 }
   0xe   : > { %s820_s8 = sshll.u32 %s1228_s23, 3  ;;  %1010 = vmatpush3.bf16.msra.mxu1 %v1007_v11  ;;  %s822_s12 = sshll.u32 %s1228_s23, 2 }
   0xf   : > { %s1092_s11 = scalar_lea.vmem %s1222_s0, %s820_s8  ;;  %s1130_s16 = scalar_lea.vmem %s1225_s3, %s822_s12 }
  0x10   : > { %v215_v12 = vld [vmem:[%s1092_s11] sm:$0xff]  ;;  %v216_v13 = vld [vmem:[%s1092_s11 + $0x8] sm:$0xff]  ;;  %v217_v14 = vld [vmem:[%s1092_s11 + $0x10] sm:$0xff]  ;;  %s1185_s19 = scalar_lea.vmem %s1226_s4, %s820_s8 }
  0x11   : > { %939 = vmatprep.mubr.msk.f32.mxu0 %vm235_vm0, %v215_v12  ;;  %v218_v15 = vld [vmem:[%s1092_s11 + $0x18] sm:$0xff]  ;;  %v219_v16 = vld [vmem:[%s1092_s11 + $0x20] sm:$0xff]  ;;  %v220_v17 = vld [vmem:[%s1092_s11 + $0x28] sm:$0xff] }
  0x12   : > { %940 = vmatmul.mubr.msk.f32.vlgmr.msra.gmra.mrb[0].mxu0 %vm235_vm0, %v216_v13  ;;  %v221_v18 = vld [vmem:[%s1092_s11 + $0x30] sm:$0xff]  ;;  %v222_v19 = vld [vmem:[%s1092_s11 + $0x38] sm:$0xff]  ;;  %v223_v20 = vld [vmem:[%s1092_s11 + $0x40] sm:$0xff] }
  0x13   : > { %942 = vmatprep.mubr.msk.f32.mxu0 %vm235_vm0, %v217_v14  ;;  %v224_v21 = vld [vmem:[%s1092_s11 + $0x48] sm:$0xff]  ;;  %v225_v22 = vld [vmem:[%s1092_s11 + $0x50] sm:$0xff]  ;;  %v226_v23 = vld [vmem:[%s1092_s11 + $0x58] sm:$0xff] }
  0x14   : > { %v227_v24 = vld [vmem:[%s1092_s11 + $0x60] sm:$0xff]  ;;  %v228_v25 = vld [vmem:[%s1092_s11 + $0x68] sm:$0xff]  ;;  %v229_v26 = vld [vmem:[%s1092_s11 + $0x70] sm:$0xff] }
  0x15   : > { %v230_v27 = vld [vmem:[%s1092_s11 + $0x78] sm:$0xff] }
  0x16   : > { %943 = vmatmul.mubr.msk.f32.gmra.mrb[2].mxu0 %vm235_vm0, %v218_v15 }
  0x17   : > { %945 = vmatprep.mubr.msk.f32.mxu0 %vm235_vm0, %v219_v16 }
  0x1a   : > { %946 = vmatmul.mubr.msk.f32.gmra.mrb[4].mxu0 %vm235_vm0, %v220_v17 }
  0x1b   : > { %948 = vmatprep.mubr.msk.f32.mxu0 %vm235_vm0, %v221_v18 }
  0x1e   : > { %949 = vmatmul.mubr.msk.f32.gmra.mrb[6].mxu0 %vm235_vm0, %v222_v19 }
  0x1f   : > { %951 = vmatprep.mubr.msk.f32.mxu0 %vm235_vm0, %v223_v20 }
  0x22   : > { %952 = vmatmul.mubr.msk.f32.gmra.mrb[8].mxu0 %vm235_vm0, %v224_v21 }
  0x23   : > { %954 = vmatprep.mubr.msk.f32.mxu0 %vm235_vm0, %v225_v22 }
  0x26   : > { %955 = vmatmul.mubr.msk.f32.gmra.mrb[10].mxu0 %vm235_vm0, %v226_v23 }
  0x27   : > { %957 = vmatprep.mubr.msk.f32.mxu0 %vm235_vm0, %v227_v24 }
  0x2a   : > { %958 = vmatmul.mubr.msk.f32.gmra.mrb[12].mxu0 %vm235_vm0, %v228_v25 }
  0x2b   : > { %960 = vmatprep.mubr.msk.f32.mxu0 %vm235_vm0, %v229_v26 }
  0x2e   : > { %961 = vmatmul.mubr.msk.f32.gmra.mrb[14].mxu0 %vm235_vm0, %v230_v27 }
  0xe5   : > { %v941_v28 = vpop.f32.mrb[0].mxu0 }
  0xe6   : > { %v876_v29 = vpack.c.bf16 %v941_v28, %v941_v28  ;;  %v350_v30 = vpop.f32.mrb[1].mxu0 }
  0xe7   : > { %v875_v31 = vpack.c.bf16 %v350_v30, %v350_v30  ;;  %971 = vmatprep.mubr.msk.f32.mxu1 %vm235_vm0, %v350_v30 }
  0xe8   : > { %709 = vst.msk [vmem:[%s1130_s16 + $0x4] sm:$0xf] %vm707_vm1, %v876_v29  ;;  %972 = vmatmul.mubr.msk.f32.vlgmr.msra.gmra.mrb[0].mxu1 %vm235_vm0, %v941_v28 }
  0xe9   : > { %708 = vst.msk [vmem:[%s1130_s16] sm:$0xf] %vm707_vm1, %v875_v31  ;;  %v944_v32 = vpop.f32.mrb[2].mxu0 }
  0xea   : > { %v878_v33 = vpack.c.bf16 %v944_v32, %v944_v32  ;;  %v360_v34 = vpop.f32.mrb[3].mxu0 }
  0xeb   : > { %v877_v35 = vpack.c.bf16 %v360_v34, %v360_v34  ;;  %974 = vmatprep.mubr.msk.f32.mxu1 %vm235_vm0, %v360_v34 }
  0xec   : > { %711 = vst.msk [vmem:[%s1130_s16 + $0xc] sm:$0xf] %vm707_vm1, %v878_v33  ;;  %975 = vmatmul.mubr.msk.f32.gmra.mrb[2].mxu1 %vm235_vm0, %v944_v32 }
  0xed   : > { %710 = vst.msk [vmem:[%s1130_s16 + $0x8] sm:$0xf] %vm707_vm1, %v877_v35  ;;  %v947_v36 = vpop.f32.mrb[4].mxu0 }
  0xee   : > { %v880_v37 = vpack.c.bf16 %v947_v36, %v947_v36  ;;  %v370_v38 = vpop.f32.mrb[5].mxu0 }
  0xef   : > { %v879_v39 = vpack.c.bf16 %v370_v38, %v370_v38  ;;  %977 = vmatprep.mubr.msk.f32.mxu1 %vm235_vm0, %v370_v38 }
  0xf0   : > { %713 = vst.msk [vmem:[%s1130_s16 + $0x14] sm:$0xf] %vm707_vm1, %v880_v37  ;;  %978 = vmatmul.mubr.msk.f32.gmra.mrb[4].mxu1 %vm235_vm0, %v947_v36 }
  0xf1   : > { %712 = vst.msk [vmem:[%s1130_s16 + $0x10] sm:$0xf] %vm707_vm1, %v879_v39  ;;  %v950_v40 = vpop.f32.mrb[6].mxu0 }
  0xf2   : > { %v882_v41 = vpack.c.bf16 %v950_v40, %v950_v40  ;;  %v380_v42 = vpop.f32.mrb[7].mxu0 }
  0xf3   : > { %v881_v43 = vpack.c.bf16 %v380_v42, %v380_v42  ;;  %980 = vmatprep.mubr.msk.f32.mxu1 %vm235_vm0, %v380_v42 }
  0xf4   : > { %715 = vst.msk [vmem:[%s1130_s16 + $0x1c] sm:$0xf] %vm707_vm1, %v882_v41  ;;  %981 = vmatmul.mubr.msk.f32.gmra.mrb[6].mxu1 %vm235_vm0, %v950_v40 }
  0xf5   : > { %714 = vst.msk [vmem:[%s1130_s16 + $0x18] sm:$0xf] %vm707_vm1, %v881_v43  ;;  %v953_v44 = vpop.f32.mrb[8].mxu0 }
  0xf6   : > { %v884_v45 = vpack.c.bf16 %v953_v44, %v953_v44  ;;  %v390_v46 = vpop.f32.mrb[9].mxu0 }
  0xf7   : > { %v883_v47 = vpack.c.bf16 %v390_v46, %v390_v46  ;;  %983 = vmatprep.mubr.msk.f32.mxu1 %vm235_vm0, %v390_v46 }
  0xf8   : > { %717 = vst.msk [vmem:[%s1130_s16 + $0x24] sm:$0xf] %vm707_vm1, %v884_v45  ;;  %984 = vmatmul.mubr.msk.f32.gmra.mrb[8].mxu1 %vm235_vm0, %v953_v44 }
  0xf9   : > { %716 = vst.msk [vmem:[%s1130_s16 + $0x20] sm:$0xf] %vm707_vm1, %v883_v47  ;;  %v956_v48 = vpop.f32.mrb[10].mxu0 }
  0xfa   : > { %v886_v49 = vpack.c.bf16 %v956_v48, %v956_v48  ;;  %v400_v50 = vpop.f32.mrb[11].mxu0 }
  0xfb   : > { %v885_v51 = vpack.c.bf16 %v400_v50, %v400_v50  ;;  %986 = vmatprep.mubr.msk.f32.mxu1 %vm235_vm0, %v400_v50 }
  0xfc   : > { %719 = vst.msk [vmem:[%s1130_s16 + $0x2c] sm:$0xf] %vm707_vm1, %v886_v49  ;;  %987 = vmatmul.mubr.msk.f32.gmra.mrb[10].mxu1 %vm235_vm0, %v956_v48 }
  0xfd   : > { %718 = vst.msk [vmem:[%s1130_s16 + $0x28] sm:$0xf] %vm707_vm1, %v885_v51  ;;  %v959_v52 = vpop.f32.mrb[12].mxu0 }
  0xfe   : > { %v888_v53 = vpack.c.bf16 %v959_v52, %v959_v52  ;;  %v410_v54 = vpop.f32.mrb[13].mxu0 }
  0xff   : > { %v887_v55 = vpack.c.bf16 %v410_v54, %v410_v54  ;;  %989 = vmatprep.mubr.msk.f32.mxu1 %vm235_vm0, %v410_v54 }
 0x100   : > { %721 = vst.msk [vmem:[%s1130_s16 + $0x34] sm:$0xf] %vm707_vm1, %v888_v53  ;;  %990 = vmatmul.mubr.msk.f32.gmra.mrb[12].mxu1 %vm235_vm0, %v959_v52 }
 0x101   : > { %720 = vst.msk [vmem:[%s1130_s16 + $0x30] sm:$0xf] %vm707_vm1, %v887_v55  ;;  %v962_v56 = vpop.f32.mrb[14].mxu0 }
 0x102   : > { %v890_v57 = vpack.c.bf16 %v962_v56, %v962_v56  ;;  %v420_v58 = vpop.f32.mrb[15].mxu0 }
 0x103   : > { %v889_v59 = vpack.c.bf16 %v420_v58, %v420_v58  ;;  %992 = vmatprep.mubr.msk.f32.mxu1 %vm235_vm0, %v420_v58 }
 0x104   : > { %723 = vst.msk [vmem:[%s1130_s16 + $0x3c] sm:$0xf] %vm707_vm1, %v890_v57  ;;  %993 = vmatmul.mubr.msk.f32.gmra.mrb[14].mxu1 %vm235_vm0, %v962_v56 }
 0x105   : > { %722 = vst.msk [vmem:[%s1130_s16 + $0x38] sm:$0xf] %vm707_vm1, %v889_v59 }
 0x1bb   : > { %v973_v60 = vpop.f32.mrb[0].mxu1 }
 0x1bc   : > { %628 = vst.msk [vmem:[%s1185_s19 + $0x8] sm:$0xff] %vm626_vm2, %v973_v60  ;;  %v547_v61 = vpop.f32.mrb[1].mxu1 }
 0x1bd   : > { %627 = vst.msk [vmem:[%s1185_s19] sm:$0xff] %vm626_vm2, %v547_v61 }
 0x1bf   : > { %v976_v62 = vpop.f32.mrb[2].mxu1 }
 0x1c0   : > { %630 = vst.msk [vmem:[%s1185_s19 + $0x18] sm:$0xff] %vm626_vm2, %v976_v62  ;;  %v557_v63 = vpop.f32.mrb[3].mxu1 }
 0x1c1   : > { %629 = vst.msk [vmem:[%s1185_s19 + $0x10] sm:$0xff] %vm626_vm2, %v557_v63 }
 0x1c3   : > { %v979_v0 = vpop.f32.mrb[4].mxu1 }
 0x1c4   : > { %632 = vst.msk [vmem:[%s1185_s19 + $0x28] sm:$0xff] %vm626_vm2, %v979_v0  ;;  %v567_v1 = vpop.f32.mrb[5].mxu1 }
 0x1c5   : > { %631 = vst.msk [vmem:[%s1185_s19 + $0x20] sm:$0xff] %vm626_vm2, %v567_v1 }
 0x1c7   : > { %v982_v2 = vpop.f32.mrb[6].mxu1 }
 0x1c8   : > { %634 = vst.msk [vmem:[%s1185_s19 + $0x38] sm:$0xff] %vm626_vm2, %v982_v2  ;;  %v577_v3 = vpop.f32.mrb[7].mxu1 }
 0x1c9   : > { %633 = vst.msk [vmem:[%s1185_s19 + $0x30] sm:$0xff] %vm626_vm2, %v577_v3 }
 0x1cb   : > { %v985_v4 = vpop.f32.mrb[8].mxu1 }
 0x1cc   : > { %636 = vst.msk [vmem:[%s1185_s19 + $0x48] sm:$0xff] %vm626_vm2, %v985_v4  ;;  %v587_v5 = vpop.f32.mrb[9].mxu1 }
 0x1cd   : > { %635 = vst.msk [vmem:[%s1185_s19 + $0x40] sm:$0xff] %vm626_vm2, %v587_v5 }
 0x1cf   : > { %v988_v6 = vpop.f32.mrb[10].mxu1 }
 0x1d0   : > { %638 = vst.msk [vmem:[%s1185_s19 + $0x58] sm:$0xff] %vm626_vm2, %v988_v6  ;;  %v597_v7 = vpop.f32.mrb[11].mxu1 }
 0x1d1   : > { %637 = vst.msk [vmem:[%s1185_s19 + $0x50] sm:$0xff] %vm626_vm2, %v597_v7 }
 0x1d3   : > { %v991_v8 = vpop.f32.mrb[12].mxu1 }
 0x1d4   : > { %640 = vst.msk [vmem:[%s1185_s19 + $0x68] sm:$0xff] %vm626_vm2, %v991_v8  ;;  %v607_v9 = vpop.f32.mrb[13].mxu1 }
 0x1d5   : > { %639 = vst.msk [vmem:[%s1185_s19 + $0x60] sm:$0xff] %vm626_vm2, %v607_v9 }
 0x1d7   : > { %v994_v10 = vpop.f32.mrb[14].mxu1 }
 0x1d8   : > { %642 = vst.msk [vmem:[%s1185_s19 + $0x78] sm:$0xff] %vm626_vm2, %v994_v10  ;;  %v617_v11 = vpop.f32.mrb[15].mxu1 }
 0x1d9   : > { %641 = vst.msk [vmem:[%s1185_s19 + $0x70] sm:$0xff] %vm626_vm2, %v617_v11 }
 0x1da PF: > { %s15_s15 = sadd.s32 1, %s1025_s15  }
 0x1db   : > { %p12_p4 = scmp.ge.s32.totalorder %s15_s15, 4  }
 0x1dd   :  { %14 = sbr.rel (!%p12_p4) target bundleno = 1 (0x1), region = 74 }

</bundles_post_ra>
